<compile_context>
chip_gen: v5e
topology: v5e:2x2
jax: 0.10.0
libtpu: 0.0.40
codegen_flags: <defaults>
</compile_context>

<pallas_src>
import functools
from math import comb

import jax
import jax.numpy as jnp
import numpy as np
from jax.experimental import pallas as pl
from jax.experimental.pallas import tpu as pltpu


def _pair(v):
    return (v, v) if isinstance(v, int) else tuple(v)


def _round_up(n, m):
    return ((n + m - 1) // m) * m


def _get_blur_kernel_np(kernel_size):
    """float64 mirror of torch get_blur_kernel (keeps its range(kh) quirk for
    the width factor; only square kernels are supported, see _build_matrices)."""
    kh, kw = _pair(kernel_size)
    a = np.array([comb(kh - 1, i) for i in range(kh)], dtype=np.float64)[:, None]
    b = np.array([comb(kw - 1, i) for i in range(kh)], dtype=np.float64)[None, :]
    k2 = a @ b
    return k2 / k2.sum()


def _build_matrices(H, W, kernel_size, stride):
    """Separable strided-blur operators over the UNPADDED spatial index space.

    Returns (MhT, Mw, (Ho, Wo, Wo_pad)) in float64, where
        out[.., yo, xo] = sum_{h,w} MhT[yo, h] * x[.., h, w] * Mw[w, xo]
    reproduces conv2d(blur, stride, padding=(k-1)//stride) exactly (taps that
    land in the zero-pad ring are omitted).  Mw's columns are zero-padded up to
    a multiple of 128 for lane-dense output stores.
    """
    kh, kw = _pair(kernel_size)
    assert kh == kw, ("get_blur_kernel builds the width factor with range(kh); "
                      "non-square kernels are not supported")
    sh, sw = _pair(stride)
    a = np.array([comb(kh - 1, i) for i in range(kh)], dtype=np.float64)
    b = np.array([comb(kw - 1, i) for i in range(kh)], dtype=np.float64)  # torch quirk
    a_n = a / a.sum()
    b_n = b / b.sum()                       # a_n outer b_n == normalized 2-D blur
    ph, pw = (kh - 1) // sh, (kw - 1) // sw  # module's padding rule
    Ho = (H + 2 * ph - kh) // sh + 1
    Wo = (W + 2 * pw - kw) // sw + 1
    Wo_pad = _round_up(Wo, 128)             # lane-dense (unmasked) output stores

    mw = np.zeros((W, Wo_pad), dtype=np.float64)
    for xo in range(Wo):
        for kx in range(kw):
            wi = sw * xo + kx - pw
            if 0 <= wi < W:
                mw[wi, xo] += b_n[kx]

    mhT = np.zeros((Ho, H), dtype=np.float64)
    for yo in range(Ho):
        for ky in range(kh):
            hi = sh * yo + ky - ph
            if 0 <= hi < H:
                mhT[yo, hi] += a_n[ky]

    return mhT, mw, (Ho, Wo, Wo_pad)


def _vmem_estimate_bytes(bt, C, G, H, W, Ho, V):
    """Rough per-grid-step VMEM footprint (double-buffered blocks + operands +
    value intermediates), accounting for (8, 128) tile padding."""
    f32 = 4
    x_blk = bt * C * _round_up(H, 8) * _round_up(W, 128) * f32
    o_blk = bt * C * _round_up(Ho, 8) * V * f32
    mats = (_round_up(W, 8) * V + _round_up(Ho, 8) * _round_up(H, 128)) * f32
    tmp = bt * G * (_round_up(H, 8) + _round_up(Ho, 8)) * V * f32
    return 2 * (x_blk + o_blk) + 2 * mats + tmp


def _auto_batch_tile(B, C, G, H, W, Ho, V, budget_bytes=12 << 20):
    """Largest batch tile that (a) divides B, (b) keeps >= 2 grid steps when
    possible (so both v7x TensorCores get work), (c) fits a conservative VMEM
    budget (safe for v7x's 64 MiB and all default scoped limits)."""
    best = 1
    for bt in range(1, B + 1):
        if B % bt:
            continue
        if B // bt < min(2, B):
            continue
        if _vmem_estimate_bytes(bt, C, G, H, W, Ho, V) <= budget_bytes:
            best = bt
    return best


def _make_blurpool_kernel(Bt, C, G, H, W, Ho, V):
    Cg = C // G
    N = Bt * G
    prec = jax.lax.Precision.HIGHEST

    def kernel(x_ref, mw_ref, mht_ref, o_ref):
        # x_ref: (Bt, C, H, W)   mw_ref: (W, V)   mht_ref: (Ho, H)
        # o_ref: (Bt, C, Ho, V)
        x = x_ref[...]

        # ---- fold the per-group channel sum BEFORE the spatial matmuls ------
        if G == C:                       # depthwise: identity
            xs = x
        elif G == 1:                     # single group: plain channel sum
            xs = jnp.sum(x, axis=1, keepdims=True)
        else:                            # general grouping
            xs = jnp.sum(x.reshape(Bt, G, Cg, H, W), axis=2)
        # xs: (Bt, G, H, W)

        # ---- separable blur, W contraction: one fused-row MXU matmul --------
        t = jnp.dot(xs.reshape(N * H, W), mw_ref[...],
                    precision=prec,
                    preferred_element_type=jnp.float32)          # (N*H, V)
        t = t.reshape(N, H, V)

        # ---- separable blur, H contraction: batched matmul, tiny shared LHS -
        mht = jnp.broadcast_to(mht_ref[...], (N, Ho, H))
        o = jax.lax.dot_general(
            mht, t,
            dimension_numbers=(((2,), (1,)), ((0,), (0,))),
            precision=prec,
            preferred_element_type=jnp.float32)                  # (N, Ho, V)

        # ---- broadcast each group's result to its Cg output channels --------
        o = o.reshape(Bt, G, 1, Ho, V)
        if Cg > 1:
            o = jnp.broadcast_to(o, (Bt, G, Cg, Ho, V))
        o_ref[...] = o.reshape(Bt, C, Ho, V).astype(o_ref.dtype)

    return kernel


def blur_pooling_2d(x, kernel_size=3, stride=2, num_groups=1, batch_tile=None):
    """x: (B, C, H, W) float32 -> (B, C, Ho, Wo) float32 (BlurPooling2d.forward).

    Jit-friendly: all constants (Mw, MhT) are baked into the program when the
    caller jits this function, so they are not re-uploaded per call.
    """
    B, C, H, W = x.shape
    G = num_groups
    assert C % G == 0, "channels must be divisible by num_groups"

    mhT64, mw64, (Ho, Wo, Wo_pad) = _build_matrices(H, W, kernel_size, stride)
    mw = jnp.asarray(mw64, dtype=jnp.float32)
    mht = jnp.asarray(mhT64, dtype=jnp.float32)

    if batch_tile is None:
        batch_tile = _auto_batch_tile(B, C, G, H, W, Ho, Wo_pad)
    Bt = batch_tile
    assert B % Bt == 0, "batch must be divisible by batch_tile"

    # NOTE: for very large H*W the per-step block would also need spatial
    # tiling (with a halo); out of scope for this module's use.
    cp_kwargs = dict(dimension_semantics=("parallel",))
    est = _vmem_estimate_bytes(Bt, C, G, H, W, Ho, Wo_pad)
    if est > (24 << 20):
        # Only raise the scoped-VMEM limit when a large tile is requested
        # (capped at v7x's 64 MiB physical VMEM).
        cp_kwargs["vmem_limit_bytes"] = int(min(est * 3 // 2, 64 << 20))

    out_pad = pl.pallas_call(
        _make_blurpool_kernel(Bt, C, G, H, W, Ho, Wo_pad),
        out_shape=jax.ShapeDtypeStruct((B, C, Ho, Wo_pad), jnp.float32),
        grid=(B // Bt,),
        in_specs=[
            pl.BlockSpec((Bt, C, H, W), lambda b: (b, 0, 0, 0)),
            pl.BlockSpec((W, Wo_pad), lambda b: (0, 0)),    # grid-invariant
            pl.BlockSpec((Ho, H), lambda b: (0, 0)),        # grid-invariant
        ],
        out_specs=pl.BlockSpec((Bt, C, Ho, Wo_pad), lambda b: (b, 0, 0, 0)),
        compiler_params=pltpu.CompilerParams(**cp_kwargs),
    )(x, mw, mht)

    return out_pad[:, :, :, :Wo]


# ------------------------- host-side references ----------------------------
def _reference_forward_np(x, kernel_size, stride, num_groups):
    """Direct float64 numpy implementation of the module's conv2d forward."""
    B, C, H, W = x.shape
    k2 = _get_blur_kernel_np(kernel_size)
    kh, kw = k2.shape
    sh, sw = _pair(stride)
    ph, pw = (kh - 1) // sh, (kw - 1) // sw
    Cg = C // num_groups
    Hp, Wp = H + 2 * ph, W + 2 * pw
    Ho, Wo = (Hp - kh) // sh + 1, (Wp - kw) // sw + 1
    xp = np.zeros((B, C, Hp, Wp), np.float64)
    xp[:, :, ph:ph + H, pw:pw + W] = x
    out = np.zeros((B, C, Ho, Wo), np.float64)
    for co in range(C):
        g = co // Cg
        for yo in range(Ho):
            for xo in range(Wo):
                patch = xp[:, g * Cg:(g + 1) * Cg,
                           yo * sh:yo * sh + kh, xo * sw:xo * sw + kw]
                out[:, co, yo, xo] = np.einsum('bcij,ij->b', patch, k2)
    return out


def _host_operator_np(x, kernel_size, stride, num_groups):
    """float64 application of exactly the math the Pallas kernel performs
    (group pre-sum, MhT @ xs @ Mw, G->C broadcast). Used to validate the
    operator construction exactly, independent of MXU arithmetic."""
    B, C, H, W = x.shape
    mhT, mw, (Ho, Wo, _) = _build_matrices(H, W, kernel_size, stride)
    G = num_groups
    Cg = C // G
    xs = x.reshape(B, G, Cg, H, W).sum(axis=2)
    t = np.einsum('bghw,wv->bghv', xs, mw)
    o = np.einsum('oh,bghv->bgov', mhT, t)
    o = np.repeat(o, Cg, axis=1)
    return o[:, :, :, :Wo]


if __name__ == "__main__":
    B, C, H, W = 2, 4, 16, 16
    x = jax.random.normal(jax.random.PRNGKey(0), (B, C, H, W), dtype=jnp.float32)
    x64 = np.asarray(x, dtype=np.float64)

    # Cover: default (G=1), depthwise (G=C), and general grouping (G=2).
    for ks, st, ng in [(3, 2, 1), (3, 2, C), (3, 2, 2)]:
        ref = _reference_forward_np(x64, ks, st, ng)

        # (a) Exact float64 validation of the separable-operator construction
        #     (tap indexing, stride/pad rule, grouping) against the conv spec.
        host = _host_operator_np(x64, ks, st, ng)
        np.testing.assert_allclose(host, ref, rtol=0, atol=1e-12)

        # (b) Device run.  Jitting bakes Mw/MhT in as constants (no per-call
        #     host->device upload).  Tolerance only absorbs MXU f32-emulation
        #     pass behavior (expected ~1e-6 with HIGHEST precision); structural
        #     bugs are already excluded by the exact check above.
        fn = jax.jit(functools.partial(blur_pooling_2d, kernel_size=ks,
                                       stride=st, num_groups=ng))
        out = jax.block_until_ready(fn(x))
        assert out.shape == ref.shape
        np.testing.assert_allclose(np.asarray(out, dtype=np.float64), ref,
                                   rtol=2e-2, atol=2e-2)

    print("KERNEL_OK")
</pallas_src>

<mosaic_0001>
module attributes {stable_mosaic.version = 11 : i64} {
  func.func @kernel(%arg0: i32, %arg1: memref<1x4x16x16xf32, #tpu.memory_space<vmem>>, %arg2: memref<16x128xf32, #tpu.memory_space<vmem>>, %arg3: memref<8x16xf32, #tpu.memory_space<vmem>>, %arg4: memref<1x4x8x128xf32, #tpu.memory_space<vmem>>) attributes {dimension_semantics = [#tpu.dimension_semantics<parallel>], iteration_bounds = array<i64: 2>, scalar_prefetch = 0 : i64, scratch_operands = 0 : i64, tpu.core_type = #tpu.core_type<tc>, window_params = [{transform_indices = @transform_0, window_bounds = array<i64: 1, 4, 16, 16>}, {pipeline_mode = #tpu.pipeline_mode<synchronous>, transform_indices = @transform_1, window_bounds = array<i64: 16, 128>}, {pipeline_mode = #tpu.pipeline_mode<synchronous>, transform_indices = @transform_2, window_bounds = array<i64: 8, 16>}, {transform_indices = @transform_3, window_bounds = array<i64: 1, 4, 8, 128>}]} {
    %c0 = arith.constant 0 : index
    %c0_0 = arith.constant 0 : index
    %c0_1 = arith.constant 0 : index
    %c0_2 = arith.constant 0 : index
    %0 = vector.load %arg1[%c0, %c0_0, %c0_1, %c0_2] : memref<1x4x16x16xf32, #tpu.memory_space<vmem>>, vector<1x4x16x16xf32>
    %cst = arith.constant dense<0.000000e+00> : vector<1x16x16xf32>
    %1 = vector.multi_reduction <add>, %0, %cst [1] : vector<1x4x16x16xf32> to vector<1x16x16xf32>
    %2 = vector.shape_cast %1 : vector<1x16x16xf32> to vector<1x1x16x16xf32>
    %3 = vector.shape_cast %2 : vector<1x1x16x16xf32> to vector<16x16xf32>
    %c0_3 = arith.constant 0 : index
    %c0_4 = arith.constant 0 : index
    %4 = vector.load %arg2[%c0_3, %c0_4] : memref<16x128xf32, #tpu.memory_space<vmem>>, vector<16x128xf32>
    %cst_5 = arith.constant dense<0.000000e+00> : vector<16x128xf32>
    %5 = tpu.matmul %3, %4, %cst_5 {dimension_numbers = #tpu.dot_dimension_numbers<[1], [0], [0], [1], [0, 0, 1, 1], [], []>, precision = #tpu.contract_precision<fp32>} : vector<16x16xf32>, vector<16x128xf32>, vector<16x128xf32> -> vector<16x128xf32>
    %6 = vector.shape_cast %5 : vector<16x128xf32> to vector<1x16x128xf32>
    %c0_6 = arith.constant 0 : index
    %c0_7 = arith.constant 0 : index
    %7 = vector.load %arg3[%c0_6, %c0_7] : memref<8x16xf32, #tpu.memory_space<vmem>>, vector<8x16xf32>
    %8 = vector.shape_cast %7 : vector<8x16xf32> to vector<1x8x16xf32>
    %cst_8 = arith.constant dense<0.000000e+00> : vector<1x8x128xf32>
    %9 = tpu.matmul %8, %6, %cst_8 {dimension_numbers = #tpu.dot_dimension_numbers<[2], [1], [1], [2], [0, 0, 0, 1, 1, 2], [0], [0]>, precision = #tpu.contract_precision<fp32>} : vector<1x8x16xf32>, vector<1x16x128xf32>, vector<1x8x128xf32> -> vector<1x8x128xf32>
    %10 = vector.shape_cast %9 : vector<1x8x128xf32> to vector<1x1x1x8x128xf32>
    %11 = vector.shape_cast %10 : vector<1x1x1x8x128xf32> to vector<1x1x1x8x128xf32>
    %12 = vector.broadcast %11 : vector<1x1x1x8x128xf32> to vector<1x1x4x8x128xf32>
    %13 = vector.shape_cast %12 : vector<1x1x4x8x128xf32> to vector<1x4x8x128xf32>
    %c0_9 = arith.constant 0 : index
    %c0_10 = arith.constant 0 : index
    %c0_11 = arith.constant 0 : index
    %c0_12 = arith.constant 0 : index
    %14 = vector.load %arg4[%c0_9, %c0_10, %c0_11, %c0_12] : memref<1x4x8x128xf32, #tpu.memory_space<vmem>>, vector<1x4x8x128xf32>
    tpu.vector_store %arg4[%c0_9, %c0_10, %c0_11, %c0_12], %13 {strides = array<i32>} : memref<1x4x8x128xf32, #tpu.memory_space<vmem>>, vector<1x4x8x128xf32>,
    return
  }
  func.func @transform_0(%arg0: i32) -> (i32, i32, i32, i32) {
    %c0_i32 = arith.constant 0 : i32
    %c0_i32_0 = arith.constant 0 : i32
    %c0_i32_1 = arith.constant 0 : i32
    %c0_i32_2 = arith.constant 0 : i32
    return %arg0, %c0_i32, %c0_i32_0, %c0_i32_1 : i32, i32, i32, i32
  }
  func.func @transform_1(%arg0: i32) -> (i32, i32) {
    %c0_i32 = arith.constant 0 : i32
    %c0_i32_0 = arith.constant 0 : i32
    %c0_i32_1 = arith.constant 0 : i32
    return %c0_i32, %c0_i32_0 : i32, i32
  }
  func.func @transform_2(%arg0: i32) -> (i32, i32) {
    %c0_i32 = arith.constant 0 : i32
    %c0_i32_0 = arith.constant 0 : i32
    %c0_i32_1 = arith.constant 0 : i32
    return %c0_i32, %c0_i32_0 : i32, i32
  }
  func.func @transform_3(%arg0: i32) -> (i32, i32, i32, i32) {
    %c0_i32 = arith.constant 0 : i32
    %c0_i32_0 = arith.constant 0 : i32
    %c0_i32_1 = arith.constant 0 : i32
    %c0_i32_2 = arith.constant 0 : i32
    return %arg0, %c0_i32, %c0_i32_0, %c0_i32_1 : i32, i32, i32, i32
  }
}

</mosaic_0001>

<bundles_post_ra>
// kernel: blur_pooling_2d.1
= control target key start
LH: loop header
LB: loop body
LE: loop exit
PB: predicated region body
PF: predicated region fallthrough
CT: control target
= control target key end

     0   :  { %8 = vsyncpa [#allocation3], 0  ;;  %s1156_s0 = inlined_call_operand.hbm [shape: f32[2,4,16,16], index: 0, kind: input, shape index: {}]   ;;  %s1157_s1 = inlined_call_operand.hbm [shape: f32[16,128], index: 1, kind: input, shape index: {}]   ;;  %s1158_s2 = inlined_call_operand.hbm [shape: f32[8,16], index: 2, kind: input, shape index: {}]   ;;  %s1159_s3 = inlined_call_operand.hbm [shape: f32[2,4,8,128], index: 3, kind: output, shape index: {}]  }
   0x1   :  { %10 = vsyncpa [#allocation3 + $0x1], 0 }
   0x2   :  { %11 = vsyncpa [#allocation6], 0 }
   0x3   :  { %12 = vsyncpa [#allocation4], 0 }
   0x4   :  { %14 = vsyncpa [#allocation4 + $0x1], 0  ;;  %s997_s12 = smov 0   ;;  %s999_s13 = smov 0  }
   0x5   :  { %s1001_s14 = smov 0   ;;  %s1003_s15 = smov 0  }
   0x6 LB: > { %s1018_s16 = sadd.s32 4294967295, %s969_s15   ;;  %s718_s17 = sadd.s32 4294967294, %s969_s15   ;;  %s969_s15 = sphi %s1003_s15, %s1169_s15   ;;  %s965_s14 = sphi %s1001_s14, %s1168_s14   ;;  %s961_s13 = sphi %s999_s13, %s1167_s13   ;;  %s957_s12 = sphi %s997_s12, %s1166_s12  }
   0x7   : > { %p40_p0 = scmp.ne.s32.totalorder %s961_s13, %s957_s12  ;;  %p41_p1 = scmp.eq.s32.totalorder %s1018_s16, 0 }
   0x8   : > { %p106_p2 = scmp.eq.s32.totalorder %s1018_s16, 1  ;;  %p112_p3 = scmp.eq.s32.totalorder %s718_s17, 1 }
   0x9   : > { %p1027_p4 = por %p41_p1, %p40_p0  ;;  %p719_p5 = scmp.ge.s32.totalorder %s969_s15, 1 }
   0xa   : > { %p1032_p6 = por %p112_p3, %p40_p0  ;;  %p119_p7 = scmp.lt.s32.totalorder %s969_s15, 3 }
   0xb   : > { %s130_s22 = sshll.u32 %s1157_s1, 4  ;;  %s971_s24 = smov [#allocation5]   ;;  %s131_s22 = int_to_ptr.hbm [resolvable:$true] %s130_s22 }
   0xc   : > { %p1040_p8 = pnand %p719_p5, %p119_p7  ;;  %s132_s25 = sshll.u32 %s971_s24, 4  ;;  %s133_s25 = int_to_ptr.vmem [resolvable:$true] %s132_s25 }
   0xd   : > { %s145_s28 = sshll.u32 %s1158_s2, 4  ;;  %s972_s29 = smov 128   ;;  %s146_s28 = int_to_ptr.hbm [resolvable:$true] %s145_s28 }
   0xe   : > { %p750_p9 = pneg %p1040_p8  ;;  %s973_s30 = smov 8  }
   0xf   : > { %s974_s4 = smov [#allocation7]   ;;  %s1056_s6 = sadd.s32 1, %s969_s15  }
  0x10   : > { %p751_p10 = pnand %p750_p9, %p41_p1  ;;  %s147_s5 = sshll.u32 %s974_s4, 4  ;;  %s148_s5 = int_to_ptr.vmem [resolvable:$true] %s147_s5 }
  0x11   : > { %s27_s7 = sadd.s32 1, %s965_s14  ;;  %s24_s8 = ssub.s32 %s969_s15, %s1056_s6 }
  0x12   : > { %753 = dma.hbm_to_vmem [thread:$0]  (!%p751_p10), %s131_s22, 256, %s133_s25, [#allocation6], %s972_s29, %s972_s29, %s973_s30  }
  0x13   : > { %756 = dma.hbm_to_vmem [thread:$0]  (!%p751_p10), %s146_s28, 128, %s148_s5, [#allocation6]  }
  0x14   : > { %p34_p12 = scmp.ne.s32.totalorder %s965_s14, %s961_s13  ;;  %p25_p13 = scmp.eq.s32.totalorder %s24_s8, 0 }
  0x15   : > { %p35_p0 = scmp.eq.s32.totalorder %s969_s15, 0  ;;  %p767_p5 = scmp.lt.s32.totalorder %s969_s15, 2 }
  0x16   : > { %p1066_p3 = por %p106_p2, %p34_p12  ;;  %s158_s11 = sand.u32 1, %s965_s14  }
  0x17   : > { %s1072_s10 = scalar_select %p25_p13, %s965_s14, %s27_s7  }
  0x18   : > { %p36_p7 = por %p35_p0, %p34_p12  ;;  %s723_s17 = sshll.u32 %s158_s11, 6 }
  0x19   : > { %s736_s20 = sshll.u32 %s969_s15, 6  ;;  %s162_s25 = scalar_lea.vmem [#allocation2], %s723_s17 }
  0x1a   : > { %s167_s24 = scalar_lea.hbm %s1156_s0, %s736_s20  ;;  %s170_s26 = sshll.u32 %s162_s25, 4  ;;  %s171_s26 = int_to_ptr.vmem [resolvable:$true] %s170_s26 }
  0x1b   : > { %s168_s27 = sshll.u32 %s167_s24, 4  ;;  %p1079_p2 = pnand %p767_p5, %p36_p7  ;;  %s169_s27 = int_to_ptr.hbm [resolvable:$true] %s168_s27 }
  0x1c   : > { %s159_s4 = scalar_lea.sflag [#allocation3], %s158_s11  ;;  %s869_s5 = sshra.s32 %s169_s27, 4  ;;  %s870_s5 = int_to_ptr.hbm [resolvable:$true] %s869_s5 }
  0x1d   : > { %s871_s7 = scalar_lea.hbm %s870_s5, 64  ;;  %p873_p10 = pneg %p1079_p2 }
  0x1e   : > { %p872_p9 = scmp.ne.s32.totalorder %s870_s5, %s871_s7  ;;  %s876_s20 = scalar_lea.hbm %s1156_s0, 128 }
  0x1f   : > { %p877_p0 = scmp.lt.s32.totalorder %s870_s5, %s1156_s0  ;;  %p878_p5 = scmp.lt.s32.totalorder %s876_s20, %s871_s7 }
  0x20   : > { %p874_p12 = pnand %p873_p10, %p872_p9 }
  0x21   : > { %p879_p7 = por %p878_p5, %p877_p0 }
  0x22   : > { %p875_p13 = pneg %p874_p12 }
  0x24   : > { %p880_p11 = pnand %p879_p7, %p875_p13 }
  0x26   : > { %883 = shalt.err (!%p880_p11)
}
  0x27   : > { %760 = dma.hbm_to_vmem [thread:$0]  (!%p1079_p2), %s169_s27, 1024, %s171_s26, %s159_s4, %s972_s29, %s972_s29, %s973_s30  }
  0x28   : > { %182 = sbr.rel (%p1040_p8) target bundleno = 388 (0x184), region = 32  ;;  %s1099_s11 = sand.u32 (!%p1040_p8), 1, %s961_s13  }
  0x29   : > { %s727_s24 = sshll.u32 (!%p1040_p8), %s1099_s11, 6  ;;  %s185_s25 = scalar_lea.sflag (!%p1040_p8), [#allocation3], %s1099_s11 }
  0x2a   : > { %s188_s5 = scalar_lea.vmem (!%p1040_p8), [#allocation2], %s727_s24 }
  0x2d   : > { %944 = dma.done.wait (%p1027_p4), %s185_s25, 1024  }
  0x2e   : > { %946 = vsyncadd (%p1027_p4), %s185_s25, 4294966272 }
  0x2f   : > { %948 = dma.done.wait (%p41_p1), [#allocation6], 384  }
  0x30   : > { %950 = vsyncadd (%p41_p1), [#allocation6], 4294966912  ;;  %vm230_vm0 = vcmask 130048   ;;  %v246_v0 = vld [vmem:[#allocation5 + $0x8] sm:$0xff]  ;;  %v245_v1 = vld [vmem:[#allocation5] sm:$0xff]  ;;  %s730_s18 = sshll.u32 %s1099_s11, 5 }
  0x31   : > { %v222_v2 = vld [vmem:[%s188_s5] sm:$0xff]  ;;  %v267_v3 = vand.u32 4294901760, %v246_v0  ;;  %v269_v4 = vand.u32 4294901760, %v245_v1  ;;  %v224_v5 = vld [vmem:[%s188_s5 + $0x10] sm:$0xff]  ;;  %v223_v11 = vld [vmem:[%s188_s5 + $0x8] sm:$0xff]  ;;  %s737_s23 = sshll.u32 %s1018_s16, 5 }
  0x32   : > { %v226_v6 = vld [vmem:[%s188_s5 + $0x20] sm:$0xff]  ;;  %v228_v7 = vld [vmem:[%s188_s5 + $0x30] sm:$0xff]  ;;  %v231_v8 = vsel %vm230_vm0, %v222_v2, 0.0  ;;  %v232_v9 = vsel %vm230_vm0, %v224_v5, 0.0  ;;  %v225_v12 = vld [vmem:[%s188_s5 + $0x18] sm:$0xff]  ;;  %v238_v18 = vsel %vm230_vm0, %v223_v11, 0.0  ;;  %s622_s26 = scalar_lea.hbm %s1159_s3, %s737_s23 }
  0x33   : > { %v234_v10 = vsel %vm230_vm0, %v226_v6, 0.0  ;;  %v227_v13 = vld [vmem:[%s188_s5 + $0x28] sm:$0xff]  ;;  %v303_v14 = vsub.f32 %v246_v0, %v267_v3  ;;  %v309_v15 = vsub.f32 %v245_v1, %v269_v4  ;;  %369 = vmatpush.msra.mxu3 %v267_v3  ;;  %v233_v16 = vadd.f32 %v232_v9, %v231_v8  ;;  %268 = vmatpush.msra.mxu0 %v267_v3  ;;  %v229_v17 = vld [vmem:[%s188_s5 + $0x38] sm:$0xff]  ;;  %v443_v52 = vld [vmem:[#allocation7] sm:$0xff]  ;;  %s221_s27 = scalar_lea.vmem [#allocation8], %s730_s18  ;;  %s625_s4 = sshll.u32 %s622_s26, 4  ;;  %s626_s4 = int_to_ptr.hbm [resolvable:$true] %s625_s4 }
  0x34   : > { %v236_v19 = vsel %vm230_vm0, %v228_v7, 0.0  ;;  %v239_v20 = vsel %vm230_vm0, %v225_v12, 0.0  ;;  %v241_v21 = vsel %vm230_vm0, %v227_v13, 0.0  ;;  %v243_v26 = vsel %vm230_vm0, %v229_v17, 0.0  ;;  %s623_s28 = sshll.u32 %s221_s27, 4  ;;  %s611_s16 = scalar_lea.sflag [#allocation4], %s1099_s11  ;;  %s624_s28 = int_to_ptr.vmem [resolvable:$true] %s623_s28 }
  0x35   : > { %339 = vmatpush.msra.mxu2 %v303_v14  ;;  %v235_v22 = vadd.f32 %v234_v10, %v233_v16  ;;  %v304_v23 = vand.u32 4294901760, %v303_v14  ;;  %371 = vmatpush.msra.mxu3 %v269_v4  ;;  %v310_v24 = vand.u32 4294901760, %v309_v15  ;;  %v240_v25 = vadd.f32 %v239_v20, %v238_v18  ;;  %s913_s7 = sshra.s32 %s626_s4, 4  ;;  %s919_s21 = scalar_lea.hbm %s1159_s3, 64  ;;  %s914_s7 = int_to_ptr.hbm [resolvable:$true] %s913_s7 }
  0x36   : > { %270 = vmatpush.msra.mxu0 %v269_v4  ;;  %v445_v55 = vsel %vm230_vm0, %v443_v52, 0  ;;  %s915_s8 = scalar_lea.hbm %s914_s7, 32  ;;  %p920_p11 = scmp.lt.s32.totalorder %s914_s7, %s1159_s3 }
  0x37   : > { %342 = vmatpush.msra.mxu2 %v309_v15  ;;  %v237_v27 = vadd.f32 %v236_v19, %v235_v22  ;;  %v305_v28 = vsub.f32 %v303_v14, %v304_v23  ;;  %v311_v29 = vsub.f32 %v309_v15, %v310_v24  ;;  %v242_v30 = vadd.f32 %v241_v21, %v240_v25  ;;  %p916_p1 = scmp.ne.s32.totalorder %s914_s7, %s915_s8  ;;  %p921_p2 = scmp.lt.s32.totalorder %s919_s21, %s915_s8 }
  0x38   : > { %402 = vmatpush.msrb.mxu0 %v304_v23  ;;  %v465_v59 = vand.u32 4294901760, %v445_v55 }
  0x39   : > { %v248_v31 = vsel %vm230_vm0, %v237_v27, 0  ;;  %v306_v32 = vand.u32 4294901760, %v305_v28  ;;  %v312_v33 = vand.u32 4294901760, %v311_v29  ;;  %v244_v34 = vadd.f32 %v243_v26, %v242_v30  ;;  %p917_p4 = pnand %p916_p1, %p1066_p3  ;;  %p922_p9 = por %p921_p2, %p920_p11 }
  0x3a   : > { %v271_v35 = vand.u32 4294901760, %v248_v31  ;;  %406 = vmatpush.msrb.mxu0 %v310_v24  ;;  %v466_v1 = vsub.f32 %v445_v55, %v465_v59 }
  0x3b   : > { %307 = vmatpush.msra.mxu1 %v306_v32  ;;  %v251_v36 = vsel %vm230_vm0, %v244_v34, 0  ;;  %p918_p8 = pneg %p917_p4 }
  0x3c   : > { %v272_v37 = vsub.f32 %v248_v31, %v271_v35  ;;  %v279_v38 = vand.u32 4294901760, %v251_v36  ;;  %v467_v5 = vand.u32 4294901760, %v466_v1 }
  0x3d   : > { %313 = vmatpush.msra.mxu1 %v312_v33  ;;  %p923_p10 = pnand %p922_p9, %p918_p8 }
  0x3e   : > { %345 = vmatmul.f32.vlgmr.msra.gmra.mxu2 %v272_v37  ;;  %v273_v39 = vand.u32 4294901760, %v272_v37  ;;  %315 = vmatmul.f32.vlgmr.msra.gmra.mxu1 %v271_v35  ;;  %v280_v40 = vsub.f32 %v251_v36, %v279_v38  ;;  %v468_v11 = vsub.f32 %v466_v1, %v467_v5 }
  0x3f   : > { %431 = vmatpush.msrb.mxu1 %v267_v3 }
  0x40   : > { %375 = vmatmul.f32.vlgmr.msra.gmra.mxu3 %v273_v39  ;;  %v274_v41 = vsub.f32 %v272_v37, %v273_v39  ;;  %v281_v42 = vand.u32 4294901760, %v280_v40  ;;  %v469_v15 = vand.u32 4294901760, %v468_v11 }
  0x41   : > { %433 = vmatpush.msrb.mxu1 %v269_v4 }
  0x42   : > { %v275_v43 = vand.u32 4294901760, %v274_v41  ;;  %v282_v44 = vsub.f32 %v280_v40, %v281_v42 }
  0x44   : > { %276 = vmatmul.f32.vlgmr.msra.gmra.mxu0 %v275_v43  ;;  %v283_v45 = vand.u32 4294901760, %v282_v44 }
  0x46   : > { %350 = vmatmul.f32.gmra.mxu2 %v280_v40  ;;  %319 = vmatmul.f32.gmra.mxu1 %v279_v38 }
  0x48   : > { %381 = vmatmul.f32.gmra.mxu3 %v281_v42 }
  0x4c   : > { %284 = vmatmul.f32.gmra.mxu0 %v283_v45 }
  0x4e   : > { %435 = vmatmul.f32.vlgmr.msrb.gmra.mxu1 %v271_v35 }
  0x54   : > { %408 = vmatmul.f32.vlgmr.msrb.gmra.mxu0 %v271_v35 }
  0x56   : > { %439 = vmatmul.f32.gmra.mxu1 %v279_v38 }
  0x5c   : > { %412 = vmatmul.f32.gmra.mxu0 %v279_v38 }
  0xbb   : > { %v316_v46 = vpop.f32.mrf.mxu1 }
  0xc1   : > { %v277_v47 = vpop.f32.mrf.mxu0  ;;  %v346_v48 = vpop.f32.mrf.mxu2 }
  0xc2   : > { %v317_v50 = vadd.f32 %v316_v46, %v277_v47 }
  0xc3   : > { %v320_v49 = vpop.f32.mrf.mxu1  ;;  %v376_v53 = vpop.f32.mrf.mxu3 }
  0xc4   : > { %v347_v54 = vadd.f32 %v346_v48, %v317_v50 }
  0xc6   : > { %v377_v57 = vadd.f32 %v376_v53, %v347_v54 }
  0xc9   : > { %v285_v51 = vpop.f32.mrf.mxu0  ;;  %v351_v60 = vpop.f32.mrf.mxu2 }
  0xca   : > { %v321_v58 = vadd.f32 %v320_v49, %v285_v51 }
  0xcb   : > { %v436_v56 = vpop.f32.mrf.mxu1  ;;  %v382_v2 = vpop.f32.mrf.mxu3 }
  0xcc   : > { %v352_v63 = vadd.f32 %v351_v60, %v321_v58 }
  0xce   : > { %v383_v3 = vadd.f32 %v382_v2, %v352_v63 }
  0xd1   : > { %v409_v61 = vpop.f32.mrf.mxu0 }
  0xd2   : > { %v410_v62 = vadd.f32 %v409_v61, %v377_v57 }
  0xd3   : > { %v440_v7 = vpop.f32.mrf.mxu1 }
  0xd4   : > { %v437_v0 = vadd.f32 %v436_v56, %v410_v62 }
  0xd6   : > { %v463_v4 = vand.u32 4294901760, %v437_v0 }
  0xd8   : > { %v495_v9 = vsub.f32 %v437_v0, %v463_v4 }
  0xd9   : > { %v413_v6 = vpop.f32.mrf.mxu0 }
  0xda   : > { %v414_v8 = vadd.f32 %v413_v6, %v383_v3  ;;  %v496_v14 = vand.u32 4294901760, %v495_v9 }
  0xdc   : > { %v441_v10 = vadd.f32 %v440_v7, %v414_v8  ;;  %v497_v18 = vsub.f32 %v495_v9, %v496_v14 }
  0xde   : > { %v461_v12 = vand.u32 4294901760, %v441_v10  ;;  %v498_v20 = vand.u32 4294901760, %v497_v18 }
  0xe0   : > { %v489_v13 = vsub.f32 %v441_v10, %v461_v12  ;;  %462 = vmatpush.msrb.mxu2 %v461_v12  ;;  %598 = vmatpush.msra.mxu1 %v461_v12 }
  0xe2   : > { %v490_v16 = vand.u32 4294901760, %v489_v13  ;;  %464 = vmatpush.msrb.mxu2 %v463_v4  ;;  %600 = vmatpush.msra.mxu1 %v463_v4 }
  0xe3   : > { %602 = vmatmul.f32.vlgmr.msra.gmra.mxu1 %v465_v59  ;;  %470 = vmatmul.f32.vlgmr.msrb.gmra.mxu2 %v469_v15 }
  0xe4   : > { %521 = vmatpush.msra.mxu2 %v489_v13  ;;  %573 = vmatpush.msra.mxu0 %v490_v16  ;;  %v491_v17 = vsub.f32 %v489_v13, %v490_v16 }
  0xe6   : > { %524 = vmatpush.msra.mxu2 %v495_v9  ;;  %577 = vmatpush.msra.mxu0 %v496_v14  ;;  %v492_v19 = vand.u32 4294901760, %v491_v17 }
  0xe7   : > { %579 = vmatmul.f32.vlgmr.msra.gmra.mxu0 %v465_v59 }
  0xe8   : > { %493 = vmatpush.msrb.mxu3 %v492_v19 }
  0xea   : > { %499 = vmatpush.msrb.mxu3 %v498_v20 }
  0xeb   : > { %501 = vmatmul.f32.vlgmr.msrb.gmra.mxu3 %v465_v59  ;;  %527 = vmatmul.f32.vlgmr.msra.gmra.mxu2 %v466_v1 }
  0xec   : > { %546 = vmatpush.msra.mxu3 %v461_v12 }
  0xee   : > { %548 = vmatpush.msra.mxu3 %v463_v4 }
  0xf3   : > { %552 = vmatmul.f32.vlgmr.msra.gmra.mxu3 %v467_v5 }
 0x160   : > { %v603_v29 = vpop.f32.mrf.mxu1 }
 0x164   : > { %v580_v27 = vpop.f32.mrf.mxu0 }
 0x166   : > { %v471_v21 = vpop.f32.mrf.mxu2 }
 0x16e   : > { %v502_v22 = vpop.f32.mrf.mxu3  ;;  %v528_v24 = vpop.f32.mrf.mxu2 }
 0x16f   : > { %v503_v23 = vadd.f32 %v502_v22, %v471_v21 }
 0x171   : > { %v529_v25 = vadd.f32 %v528_v24, %v503_v23 }
 0x176   : > { %v553_v26 = vpop.f32.mrf.mxu3 }
 0x177   : > { %v554_v28 = vadd.f32 %v553_v26, %v529_v25 }
 0x179   : > { %v581_v30 = vadd.f32 %v580_v27, %v554_v28 }
 0x17b   : > { %v604_v31 = vadd.f32 %v603_v29, %v581_v30 }
 0x17d   : > { %606 = vst [vmem:[%s221_s27] sm:$0xff] %v604_v31 }
 0x17e   : > { %607 = vst [vmem:[%s221_s27 + $0x8] sm:$0xff] %v604_v31 }
 0x17f   : > { %608 = vst [vmem:[%s221_s27 + $0x10] sm:$0xff] %v604_v31 }
 0x180   : > { %609 = vst [vmem:[%s221_s27 + $0x18] sm:$0xff] %v604_v31 }
 0x181   : > { %926 = shalt.err (!%p923_p10)
}
 0x182   : > { %s975_s11 = smov 128   ;;  %s976_s25 = smov 8  }
 0x183   : > { %748 = dma.vmem_to_hbm [thread:$0]  (%p1066_p3), %s624_s28, 512, %s626_s4, %s611_s16, %s975_s11, %s975_s11, %s976_s25  }
 0x184 PF: > { %s640_s5 = sand.u32 1, %s957_s12   ;;  %p1165_p12 = scmp.ge.s32.totalorder %s969_s15, 2 }
 0x185   : > { %s641_s18 = scalar_lea.sflag [#allocation4], %s640_s5 }
 0x186   : > { %p762_p13 = pnand %p1165_p12, %p1032_p6 }
 0x188   : > { %p763_p0 = pneg %p762_p13 }
 0x18a   : > { %952 = dma.done.wait (%p763_p0), %s641_s18, 512  }
 0x18b   : > { %954 = vsyncadd (%p763_p0), %s641_s18, 4294966784  ;;  %p17_p5 = scmp.ge.s32.totalorder %s1056_s6, 4   ;;  %s1166_s12 = smov %s961_s13 }
 0x18c   : > { %s1167_s13 = smov %s965_s14  ;;  %s1168_s14 = smov %s1072_s10 }
 0x18d   : > { %s1169_s15 = smov %s1056_s6  ;;  %19 = sbr.rel (!%p17_p5) target bundleno = 6 (0x6), region = 85 }
 0x192   :  { %647 = vsyncpa [#allocation3], 1 }
 0x193   :  { %649 = vsyncpa [#allocation3 + $0x1], 1 }
 0x194   :  { %650 = vsyncpa [#allocation6], 1 }
 0x195   :  { %651 = vsyncpa [#allocation4], 1 }
 0x196   :  { %653 = vsyncpa [#allocation4 + $0x1], 1 }

</bundles_post_ra>
